<compile_context>
chip_gen: v7x
topology: tpu7x:2x2x1
jax: 0.10.0
libtpu: 0.0.40
codegen_flags: <defaults>
</compile_context>

<pallas_src>
import functools

import jax
import jax.numpy as jnp
from jax.experimental import pallas as pl
from jax.experimental.pallas import tpu as pltpu


def _infonce_lse_kernel(q_ref, k_ref, o_ref, m_ref, l_ref, *rest,
                        n, tile, padded, inv_temp, n_dchunks):
    """One (row_block, col_block, d_chunk) grid step of the online logsumexp."""
    qi = pl.program_id(0)
    ki = pl.program_id(1)
    nk = pl.num_programs(1)
    last_k = ki == nk - 1
    multi_d = n_dchunks > 1
    di = pl.program_id(2)

    first_step = jnp.logical_and(ki == 0, di == 0) if multi_d else (ki == 0)

    @pl.when(first_step)
    def _init():
        # Finite (not -inf) init keeps exp(m_prev - m_new) NaN-free even if an
        # entire tile were ever fully masked (robustness; per review).
        m_ref[...] = jnp.full(m_ref.shape, -1e30, m_ref.dtype)
        l_ref[...] = jnp.zeros(l_ref.shape, l_ref.dtype)

    # Partial similarity tile on the MXU: contract the feature (lane) axis of
    # both operands (no XLU transpose), f32 accumulation.
    part = jax.lax.dot_general(
        q_ref[...], k_ref[...], (((1,), (1,)), ((), ())),
        preferred_element_type=jnp.float32)

    def _online_update(s_tile):
        m_prev = m_ref[...]
        m_new = jnp.maximum(m_prev, jnp.max(s_tile, axis=-1, keepdims=True))
        alpha = jnp.exp(m_prev - m_new)
        l_ref[...] = alpha * l_ref[...] + jnp.sum(
            jnp.exp(s_tile - m_new), axis=-1, keepdims=True)
        m_ref[...] = m_new
        # NOTE: for tiny D (MXU idle) the row-sum above could be moved onto the
        # MXU as exp_tile @ ones if the XLU slot ever binds; left on XLU here.

    def _diag_mask():
        # On diagonal tiles qi == ki, so global row == col reduces to a purely
        # local iota equality (no +qi*tile / +ki*tile adds).
        return (jax.lax.broadcasted_iota(jnp.int32, (tile, tile), 0)
                == jax.lax.broadcasted_iota(jnp.int32, (tile, tile), 1))

    def _pad_mask():
        # Padded columns of the last column block: only the lane index matters.
        return (jax.lax.broadcasted_iota(jnp.int32, (tile, tile), 1)
                >= n - ki * tile)

    def _process(s_raw):
        # Scale logits by 1/temperature in f32 (matches the reference; one VPU
        # mul per element that hides under MXU slack).
        s = s_raw * inv_temp
        is_diag = qi == ki

        if padded:
            @pl.when(jnp.logical_and(is_diag, last_k))
            def _():
                bad = jnp.logical_or(_diag_mask(), _pad_mask())
                _online_update(jnp.where(bad, -jnp.inf, s))

            @pl.when(jnp.logical_and(is_diag, jnp.logical_not(last_k)))
            def _():
                _online_update(jnp.where(_diag_mask(), -jnp.inf, s))

            @pl.when(jnp.logical_and(jnp.logical_not(is_diag), last_k))
            def _():
                _online_update(jnp.where(_pad_mask(), -jnp.inf, s))

            @pl.when(jnp.logical_and(jnp.logical_not(is_diag),
                                     jnp.logical_not(last_k)))
            def _():
                _online_update(s)
        else:
            @pl.when(is_diag)
            def _():
                _online_update(jnp.where(_diag_mask(), -jnp.inf, s))

            @pl.when(jnp.logical_not(is_diag))
            def _():
                _online_update(s)

        @pl.when(last_k)
        def _finalize():
            # Per-row logsumexp over all j != i. Padded rows hold finite junk
            # values that the wrapper slices off before the mean.
            # (Kept as a (tile, 1) store: one tiny write per row block.)
            o_ref[...] = m_ref[...] + jnp.log(l_ref[...])

    if multi_d:
        s_ref = rest[0]

        @pl.when(di == 0)
        def _overwrite():
            s_ref[...] = part

        @pl.when(di != 0)
        def _accumulate():
            s_ref[...] = s_ref[...] + part

        @pl.when(di == n_dchunks - 1)
        def _last_chunk():
            _process(s_ref[...])
    else:
        _process(part)


def _tpu_hw_params():
    """Returns (vmem_budget, vmem_limit, multi_tensorcore, mxu_preferred_tile)."""
    vmem_cap = None
    try:
        info = pltpu.get_tpu_info()
        vmem_cap = getattr(info, "vmem_capacity_bytes", None)
    except Exception:
        vmem_cap = None
    kind = ""
    try:
        kind = jax.devices()[0].device_kind.lower()
    except Exception:
        pass
    is_v7 = ("v7" in kind) or ("tpu7" in kind)
    if not vmem_cap:
        vmem_cap = (64 << 20) if (is_v7 or not kind) else (128 << 20)
    if vmem_cap >= (96 << 20):        # v5e / v6e class: 128 MiB VMEM per core
        budget, limit = 88 << 20, 104 << 20
    else:                             # v7x class: 64 MiB per TensorCore (or unknown)
        budget, limit = 40 << 20, 56 << 20
    # Parts whose "parallel" grid axes shard across two cores.
    multi_tc = is_v7 or ("v4" in kind) or ("v5p" in kind)
    # MXU-preferred s-tile edge: 256 on the 2x256^2 MXUs (v6e/v7x), 128 otherwise.
    min_tile = 256 if (is_v7 or "v6" in kind or not kind) else 128
    return budget, limit, multi_tc, min_tile


def _plan_tiling(n_rows, dim, itemsize, *, budget, min_tile, multi_tc):
    """Pick (tile, d_chunk, n_dchunks) for the similarity tile."""
    n8 = max(8, -(-n_rows // 8) * 8)
    tile_max = min(512, n8)
    if multi_tc and n8 >= 16:
        # Ensure >= 2 row blocks so the parallel axis shards across both cores.
        half_up = (-(-n8 // 2) + 7) // 8 * 8
        tile_max = min(tile_max, half_up)

    def vmem_est(t, dc, chunked):
        b = 2 * 2 * t * dc * itemsize      # q & k blocks, double-buffered
        b += 4 * t * 128 * 4               # (t, 1) out / m / l buffers (lane-padded)
        b += 4 * t * t * 4                 # f32 tile temporaries (s, exp, masks)
        if chunked:
            b += t * t * 4                 # s accumulator scratch
        return b

    cands = {c for c in (512, 256, 128, 64, 32, 16, 8) if c <= tile_max}
    if n8 <= 512:
        cands.add(min(n8, tile_max))       # exact-fit tile when rows are few
    cands = sorted(cands, reverse=True)

    fitting = [t for t in cands if vmem_est(t, dim, False) <= budget]
    full_t = None
    if fitting:
        # Total O(N^2*D) work scales with n_pad^2 -> minimize padding first,
        # then prefer the largest tile (fewer grid steps, fuller MXU).
        full_t = min(fitting, key=lambda t: (-(-n8 // t) * t, -t))

    pref = min(min_tile, tile_max)
    if full_t is not None and (full_t >= pref or dim <= 512):
        return full_t, dim, 1

    # Large D would force the tile below the MXU-preferred edge: chunk the
    # feature axis (extra inner grid axis) instead of shrinking T.
    t = max(pref, 8)
    for nd in range(2, max(3, dim // 128 + 2)):
        dc = (-(-dim // nd) + 127) // 128 * 128
        if vmem_est(t, dc, True) <= budget:
            return t, dc, nd
    return t, 128, -(-dim // 128)


def infonce_loss_2(aug_hidden1, aug_hidden2, *, temperature, similarity_type,
                   vmem_budget_bytes=None, _plan_override=None):
    """Pallas implementation of InfoNCELoss_2.forward. Returns a scalar f32."""
    if aug_hidden1.ndim > 2:
        aug_hidden1 = aug_hidden1.reshape(aug_hidden1.shape[0], -1)
        aug_hidden2 = aug_hidden2.reshape(aug_hidden2.shape[0], -1)
    if similarity_type not in ("cos", "dot"):
        raise ValueError(
            f"Invalid similarity_type for cs loss: [current:{similarity_type}]. "
            "Please choose from ['cos', 'dot']")

    in_dtype = aug_hidden1.dtype
    batch, dim = aug_hidden1.shape
    n = 2 * batch
    inv_temp = 1.0 / float(temperature)

    all_hidden = jnp.concatenate([aug_hidden1, aug_hidden2], axis=0)   # (N, D)

    # O(N*D) preprocessing off the N^2 path: optional L2 normalization
    # (F.normalize, eps=1e-12) in f32, then back to the input dtype for the MXU.
    xf = all_hidden.astype(jnp.float32)
    if similarity_type == "cos":
        sumsq = jnp.sum(xf * xf, axis=-1, keepdims=True)
        xf = xf * jax.lax.rsqrt(jnp.maximum(sumsq, 1e-24))
    y = xf.astype(in_dtype)

    # Positive logit sim[i, (i + batch) mod N] / temperature: tiny O(N*D)
    # wrapper op -> the partner rows never enter the kernel (perf-review item 1).
    partner = jnp.concatenate([y[batch:], y[:batch]], axis=0)
    pos = jnp.sum(y.astype(jnp.float32) * partner.astype(jnp.float32),
                  axis=-1) * inv_temp                                   # (N,)

    budget, vmem_limit, multi_tc, min_tile = _tpu_hw_params()
    if vmem_budget_bytes is not None:
        budget = vmem_budget_bytes
    itemsize = jnp.dtype(in_dtype).itemsize

    if _plan_override is not None:
        tile, dchunk, n_dchunks = _plan_override
    else:
        tile, dchunk, n_dchunks = _plan_tiling(
            n, dim, itemsize, budget=budget, min_tile=min_tile, multi_tc=multi_tc)

    n_pad = -(-n // tile) * tile
    d_pad = dim if (n_dchunks == 1 and dchunk == dim) else dchunk * n_dchunks
    padded_rows = n_pad != n
    if padded_rows or d_pad != dim:
        # Zero rows / feature columns are inert (zero dot products); padded
        # *similarity columns* are masked inside the kernel.
        y = jnp.pad(y, ((0, n_pad - n), (0, d_pad - dim)))

    grid = (n_pad // tile, n_pad // tile, n_dchunks)
    kernel = functools.partial(
        _infonce_lse_kernel, n=n, tile=tile, padded=padded_rows,
        inv_temp=inv_temp, n_dchunks=n_dchunks)

    scratch_shapes = [pltpu.VMEM((tile, 1), jnp.float32),   # running max
                      pltpu.VMEM((tile, 1), jnp.float32)]   # running sum(exp)
    if n_dchunks > 1:
        scratch_shapes.append(pltpu.VMEM((tile, tile), jnp.float32))  # s accumulator

    q_bytes = (n_pad * d_pad * itemsize if n_dchunks == 1
               else (n_pad // tile) * n_pad * d_pad * itemsize)
    k_bytes = (n_pad // tile) * n_pad * d_pad * itemsize
    cost = pl.CostEstimate(
        flops=2 * n_pad * n_pad * d_pad,
        transcendentals=n_pad * n_pad,
        bytes_accessed=int(q_bytes + k_bytes + n_pad * 4))

    lse = pl.pallas_call(
        kernel,
        grid=grid,
        in_specs=[
            pl.BlockSpec((tile, dchunk), lambda qi, ki, di: (qi, di)),  # query rows
            pl.BlockSpec((tile, dchunk), lambda qi, ki, di: (ki, di)),  # streamed keys
        ],
        out_specs=pl.BlockSpec((tile, 1), lambda qi, ki, di: (qi, 0)),
        out_shape=jax.ShapeDtypeStruct((n_pad, 1), jnp.float32),
        scratch_shapes=scratch_shapes,
        compiler_params=pltpu.CompilerParams(
            dimension_semantics=("parallel", "arbitrary", "arbitrary"),
            vmem_limit_bytes=int(vmem_limit)),
        cost_estimate=cost,
    )(y, y)

    # nn.CrossEntropyLoss(mean): lse - positive logit, averaged over the N valid
    # rows (padded rows hold finite junk and are sliced off here).
    return jnp.mean(lse[:n, 0] - pos)


def _reference(aug_hidden1, aug_hidden2, *, temperature, similarity_type):
    """Pure-JAX reference mirroring the PyTorch module exactly."""
    if aug_hidden1.ndim > 2:
        aug_hidden1 = aug_hidden1.reshape(aug_hidden1.shape[0], -1)
        aug_hidden2 = aug_hidden2.reshape(aug_hidden2.shape[0], -1)
    b = aug_hidden1.shape[0]
    n = 2 * b
    h = jnp.concatenate([aug_hidden1, aug_hidden2], axis=0).astype(jnp.float32)
    if similarity_type == "cos":
        h = h / jnp.maximum(jnp.linalg.norm(h, axis=-1, keepdims=True), 1e-12)
    sim = (h @ h.T) / temperature
    pos = jnp.concatenate([jnp.diagonal(sim, b), jnp.diagonal(sim, -b)]).reshape(n, 1)
    mask = jnp.ones((n, n), dtype=bool)
    mask = mask.at[jnp.arange(n), jnp.arange(n)].set(False)
    idx = jnp.concatenate([jnp.arange(b) + b, jnp.arange(b)])
    mask = mask.at[jnp.arange(n), idx].set(False)
    neg = sim[mask].reshape(n, n - 2)
    logits = jnp.concatenate([pos, neg], axis=1)
    lse = jax.scipy.special.logsumexp(logits, axis=-1)
    return jnp.mean(lse - logits[:, 0])


if __name__ == "__main__":
    key = jax.random.PRNGKey(0)
    k1, k2, k3, k4, k5, k6, k7, k8 = jax.random.split(key, 8)

    # Test 1: cos similarity, 2-D inputs, single (or megacore-split) tile.
    a1 = jax.random.normal(k1, (8, 32), dtype=jnp.float32)
    a2 = jax.random.normal(k2, (8, 32), dtype=jnp.float32)
    out1 = jax.block_until_ready(
        infonce_loss_2(a1, a2, temperature=0.5, similarity_type="cos"))
    ref1 = _reference(a1, a2, temperature=0.5, similarity_type="cos")
    assert jnp.allclose(out1, ref1, atol=2e-4, rtol=2e-4), (out1, ref1)

    # Test 2: row padding (N=42) -> combined diagonal + padded-column masking.
    b1 = jax.random.normal(k3, (21, 48), dtype=jnp.float32)
    b2 = jax.random.normal(k4, (21, 48), dtype=jnp.float32)
    out2 = jax.block_until_ready(
        infonce_loss_2(b1, b2, temperature=0.5, similarity_type="cos"))
    ref2 = _reference(b1, b2, temperature=0.5, similarity_type="cos")
    assert jnp.allclose(out2, ref2, atol=2e-4, rtol=2e-4), (out2, ref2)

    # Test 3: dot similarity with 3-D inputs (flattened to [batch, -1]).
    c1 = 0.3 * jax.random.normal(k5, (6, 4, 8), dtype=jnp.float32)
    c2 = 0.3 * jax.random.normal(k6, (6, 4, 8), dtype=jnp.float32)
    out3 = jax.block_until_ready(
        infonce_loss_2(c1, c2, temperature=0.5, similarity_type="dot"))
    ref3 = _reference(c1, c2, temperature=0.5, similarity_type="dot")
    assert jnp.allclose(out3, ref3, atol=2e-4, rtol=2e-4), (out3, ref3)

    # Test 4: feature-chunked path (3-axis grid): D=640 split into 3 chunks of
    # 256 lanes, 2x2 row/col blocks with row padding (N=60 -> 64).
    d1 = jax.random.normal(k7, (30, 640), dtype=jnp.float32)
    d2 = jax.random.normal(k8, (30, 640), dtype=jnp.float32)
    out4 = jax.block_until_ready(
        infonce_loss_2(d1, d2, temperature=0.5, similarity_type="cos",
                       _plan_override=(32, 256, 3)))
    ref4 = _reference(d1, d2, temperature=0.5, similarity_type="cos")
    assert jnp.allclose(out4, ref4, atol=2e-3, rtol=2e-3), (out4, ref4)

    print("KERNEL_OK")
</pallas_src>

<mosaic_0001>
module attributes {stable_mosaic.version = 11 : i64} {
  func.func @_infonce_lse_kernel(%arg0: i32, %arg1: i32, %arg2: i32, %arg3: memref<16x32xf32, #tpu.memory_space<vmem>>, %arg4: memref<16x32xf32, #tpu.memory_space<vmem>>, %arg5: memref<16x1xf32, #tpu.memory_space<vmem>>, %arg6: memref<16x1xf32, #tpu.memory_space<vmem>>, %arg7: memref<16x1xf32, #tpu.memory_space<vmem>>) attributes {dimension_semantics = [#tpu.dimension_semantics<parallel>, #tpu.dimension_semantics<arbitrary>, #tpu.dimension_semantics<arbitrary>], iteration_bounds = array<i64: 1, 1, 1>, scalar_prefetch = 0 : i64, scratch_operands = 2 : i64, tpu.core_type = #tpu.core_type<tc>, window_params = [{transform_indices = @transform_0, window_bounds = array<i64: 16, 32>}, {transform_indices = @transform_1, window_bounds = array<i64: 16, 32>}, {transform_indices = @transform_2, window_bounds = array<i64: 16, 1>}]} {
    %c0_i32 = arith.constant 0 : i32
    %0 = arith.cmpi eq, %arg1, %c0_i32 : i32
    %c0_i32_0 = arith.constant 0 : i32
    %1 = arith.cmpi eq, %arg1, %c0_i32_0 : i32
    %2 = arith.extui %1 : i1 to i32
    %c0_i32_1 = arith.constant 0 : i32
    %3 = arith.cmpi ne, %2, %c0_i32_1 : i32
    scf.if %3 {
      %cst_9 = arith.constant -1.000000e+30 : f32
      %17 = vector.broadcast %cst_9 : f32 to vector<16x1xf32>
      %c0_10 = arith.constant 0 : index
      %c0_11 = arith.constant 0 : index
      %18 = vector.load %arg6[%c0_10, %c0_11] : memref<16x1xf32, #tpu.memory_space<vmem>>, vector<16x1xf32>
      tpu.vector_store %arg6[%c0_10, %c0_11], %17 {strides = array<i32>} : memref<16x1xf32, #tpu.memory_space<vmem>>, vector<16x1xf32>,
      %cst_12 = arith.constant 0.000000e+00 : f32
      %19 = vector.broadcast %cst_12 : f32 to vector<16x1xf32>
      %c0_13 = arith.constant 0 : index
      %c0_14 = arith.constant 0 : index
      %20 = vector.load %arg7[%c0_13, %c0_14] : memref<16x1xf32, #tpu.memory_space<vmem>>, vector<16x1xf32>
      tpu.vector_store %arg7[%c0_13, %c0_14], %19 {strides = array<i32>} : memref<16x1xf32, #tpu.memory_space<vmem>>, vector<16x1xf32>,
    } else {
    }
    %c0 = arith.constant 0 : index
    %c0_2 = arith.constant 0 : index
    %4 = vector.load %arg3[%c0, %c0_2] : memref<16x32xf32, #tpu.memory_space<vmem>>, vector<16x32xf32>
    %c0_3 = arith.constant 0 : index
    %c0_4 = arith.constant 0 : index
    %5 = vector.load %arg4[%c0_3, %c0_4] : memref<16x32xf32, #tpu.memory_space<vmem>>, vector<16x32xf32>
    %cst = arith.constant dense<0.000000e+00> : vector<16x16xf32>
    %6 = tpu.matmul %4, %5, %cst {dimension_numbers = #tpu.dot_dimension_numbers<[1], [1], [0], [0], [0, 0, 1, 0], [], []>} : vector<16x32xf32>, vector<16x32xf32>, vector<16x16xf32> -> vector<16x16xf32>
    %cst_5 = arith.constant 2.000000e+00 : f32
    %7 = vector.broadcast %cst_5 : f32 to vector<16x16xf32>
    %8 = arith.mulf %6, %7 : vector<16x16xf32>
    %9 = arith.cmpi eq, %arg0, %arg1 : i32
    %10 = arith.extui %9 : i1 to i32
    %c0_i32_6 = arith.constant 0 : i32
    %11 = arith.cmpi ne, %10, %c0_i32_6 : i32
    scf.if %11 {
      %17 = tpu.iota {dimensions = array<i32: 0>} : vector<16x16xi32>
      %18 = tpu.iota {dimensions = array<i32: 1>} : vector<16x16xi32>
      %19 = arith.cmpi eq, %17, %18 : vector<16x16xi32>
      %cst_9 = arith.constant 0xFF800000 : f32
      %20 = vector.broadcast %cst_9 : f32 to vector<16x16xf32>
      %21 = arith.select %19, %20, %8 : vector<16x16xi1>, vector<16x16xf32>
      %c0_10 = arith.constant 0 : index
      %c0_11 = arith.constant 0 : index
      %22 = vector.load %arg6[%c0_10, %c0_11] : memref<16x1xf32, #tpu.memory_space<vmem>>, vector<16x1xf32>
      %cst_12 = arith.constant dense<0xFF800000> : vector<16xf32>
      %23 = vector.multi_reduction <maximumf>, %21, %cst_12 [1] : vector<16x16xf32> to vector<16xf32>
      %24 = vector.shape_cast %23 : vector<16xf32> to vector<16x1xf32>
      %25 = arith.maximumf %22, %24 : vector<16x1xf32>
      %26 = arith.subf %22, %25 : vector<16x1xf32>
      %27 = math.exp %26 : vector<16x1xf32>
      %c0_13 = arith.constant 0 : index
      %c0_14 = arith.constant 0 : index
      %28 = vector.load %arg7[%c0_13, %c0_14] : memref<16x1xf32, #tpu.memory_space<vmem>>, vector<16x1xf32>
      %29 = arith.mulf %27, %28 : vector<16x1xf32>
      %30 = vector.broadcast %25 : vector<16x1xf32> to vector<16x16xf32>
      %31 = arith.subf %21, %30 : vector<16x16xf32>
      %32 = math.exp %31 : vector<16x16xf32>
      %cst_15 = arith.constant dense<0.000000e+00> : vector<16xf32>
      %33 = vector.multi_reduction <add>, %32, %cst_15 [1] : vector<16x16xf32> to vector<16xf32>
      %34 = vector.shape_cast %33 : vector<16xf32> to vector<16x1xf32>
      %35 = arith.addf %29, %34 : vector<16x1xf32>
      %c0_16 = arith.constant 0 : index
      %c0_17 = arith.constant 0 : index
      %36 = vector.load %arg7[%c0_16, %c0_17] : memref<16x1xf32, #tpu.memory_space<vmem>>, vector<16x1xf32>
      tpu.vector_store %arg7[%c0_16, %c0_17], %35 {strides = array<i32>} : memref<16x1xf32, #tpu.memory_space<vmem>>, vector<16x1xf32>,
      %c0_18 = arith.constant 0 : index
      %c0_19 = arith.constant 0 : index
      %37 = vector.load %arg6[%c0_18, %c0_19] : memref<16x1xf32, #tpu.memory_space<vmem>>, vector<16x1xf32>
      tpu.vector_store %arg6[%c0_18, %c0_19], %25 {strides = array<i32>} : memref<16x1xf32, #tpu.memory_space<vmem>>, vector<16x1xf32>,
    } else {
    }
    %true = arith.constant true
    %12 = arith.xori %9, %true : i1
    %13 = arith.extui %12 : i1 to i32
    %c0_i32_7 = arith.constant 0 : i32
    %14 = arith.cmpi ne, %13, %c0_i32_7 : i32
    scf.if %14 {
      %c0_9 = arith.constant 0 : index
      %c0_10 = arith.constant 0 : index
      %17 = vector.load %arg6[%c0_9, %c0_10] : memref<16x1xf32, #tpu.memory_space<vmem>>, vector<16x1xf32>
      %cst_11 = arith.constant dense<0xFF800000> : vector<16xf32>
      %18 = vector.multi_reduction <maximumf>, %8, %cst_11 [1] : vector<16x16xf32> to vector<16xf32>
      %19 = vector.shape_cast %18 : vector<16xf32> to vector<16x1xf32>
      %20 = arith.maximumf %17, %19 : vector<16x1xf32>
      %21 = arith.subf %17, %20 : vector<16x1xf32>
      %22 = math.exp %21 : vector<16x1xf32>
      %c0_12 = arith.constant 0 : index
      %c0_13 = arith.constant 0 : index
      %23 = vector.load %arg7[%c0_12, %c0_13] : memref<16x1xf32, #tpu.memory_space<vmem>>, vector<16x1xf32>
      %24 = arith.mulf %22, %23 : vector<16x1xf32>
      %25 = vector.broadcast %20 : vector<16x1xf32> to vector<16x16xf32>
      %26 = arith.subf %8, %25 : vector<16x16xf32>
      %27 = math.exp %26 : vector<16x16xf32>
      %cst_14 = arith.constant dense<0.000000e+00> : vector<16xf32>
      %28 = vector.multi_reduction <add>, %27, %cst_14 [1] : vector<16x16xf32> to vector<16xf32>
      %29 = vector.shape_cast %28 : vector<16xf32> to vector<16x1xf32>
      %30 = arith.addf %24, %29 : vector<16x1xf32>
      %c0_15 = arith.constant 0 : index
      %c0_16 = arith.constant 0 : index
      %31 = vector.load %arg7[%c0_15, %c0_16] : memref<16x1xf32, #tpu.memory_space<vmem>>, vector<16x1xf32>
      tpu.vector_store %arg7[%c0_15, %c0_16], %30 {strides = array<i32>} : memref<16x1xf32, #tpu.memory_space<vmem>>, vector<16x1xf32>,
      %c0_17 = arith.constant 0 : index
      %c0_18 = arith.constant 0 : index
      %32 = vector.load %arg6[%c0_17, %c0_18] : memref<16x1xf32, #tpu.memory_space<vmem>>, vector<16x1xf32>
      tpu.vector_store %arg6[%c0_17, %c0_18], %20 {strides = array<i32>} : memref<16x1xf32, #tpu.memory_space<vmem>>, vector<16x1xf32>,
    } else {
    }
    %15 = arith.extui %0 : i1 to i32
    %c0_i32_8 = arith.constant 0 : i32
    %16 = arith.cmpi ne, %15, %c0_i32_8 : i32
    scf.if %16 {
      %c0_9 = arith.constant 0 : index
      %c0_10 = arith.constant 0 : index
      %17 = vector.load %arg6[%c0_9, %c0_10] : memref<16x1xf32, #tpu.memory_space<vmem>>, vector<16x1xf32>
      %c0_11 = arith.constant 0 : index
      %c0_12 = arith.constant 0 : index
      %18 = vector.load %arg7[%c0_11, %c0_12] : memref<16x1xf32, #tpu.memory_space<vmem>>, vector<16x1xf32>
      %19 = math.log %18 : vector<16x1xf32>
      %20 = arith.addf %17, %19 : vector<16x1xf32>
      %c0_13 = arith.constant 0 : index
      %c0_14 = arith.constant 0 : index
      %21 = vector.load %arg5[%c0_13, %c0_14] : memref<16x1xf32, #tpu.memory_space<vmem>>, vector<16x1xf32>
      tpu.vector_store %arg5[%c0_13, %c0_14], %20 {strides = array<i32>} : memref<16x1xf32, #tpu.memory_space<vmem>>, vector<16x1xf32>,
    } else {
    }
    return
  }
  func.func @transform_0(%arg0: i32, %arg1: i32, %arg2: i32) -> (i32, i32) {
    %c0_i32 = arith.constant 0 : i32
    return %arg0, %arg2 : i32, i32
  }
  func.func @transform_1(%arg0: i32, %arg1: i32, %arg2: i32) -> (i32, i32) {
    %c0_i32 = arith.constant 0 : i32
    return %arg1, %arg2 : i32, i32
  }
  func.func @transform_2(%arg0: i32, %arg1: i32, %arg2: i32) -> (i32, i32) {
    %c0_i32 = arith.constant 0 : i32
    %c0_i32_0 = arith.constant 0 : i32
    return %arg0, %c0_i32 : i32, i32
  }
}

</mosaic_0001>

<bundles_post_ra>
// kernel: tpu_custom_call.1
= control target key start
LH: loop header
LB: loop body
LE: loop exit
PB: predicated region body
PF: predicated region fallthrough
CT: control target
= control target key end

     0   :  { %7 = vsyncpa [#allocation5], 0  ;;  %s491_s0 = inlined_call_operand.hbm [shape: f32[16,32], index: 0, kind: input, shape index: {}]   ;;  %s492_s1 = inlined_call_operand.hbm [shape: f32[16,32], index: 1, kind: input, shape index: {}]   ;;  %s493_s2 = inlined_call_operand.hbm [shape: f32[16,1], index: 2, kind: output, shape index: {}]  }
   0x1   :  { %8 = vsyncpa [#allocation8], 0 }
   0x2   :  { %9 = vsyncpa [#allocation6], 0  ;;  %s409_s9 = smov [#allocation4]   ;;  %s337_s13 = scalar_lea.hbm %s491_s0, 256 }
   0x3   :  { %s15_s10 = sshll.u32 %s409_s9, 4  ;;  %p338_p0 = scmp.ne.s32.totalorder %s491_s0, %s337_s13  ;;  %s16_s10 = int_to_ptr.vmem [resolvable:$true] %s15_s10 }
   0x4   :  { %p341_p1 = scmp.lt.u32.totalorder %s337_s13, %s491_s0 }
   0x6   :  { %p343_p2 = pnand %p341_p1, %p338_p0 }
   0x8   :  { %346 = shalt.err (!%p343_p2)
}
   0x9   :  { %s347_s18 = scalar_lea.vmem %s16_s10, 256  ;;  %p352_p4 = scmp.lt.s32.totalorder %s16_s10, %s16_s10 }
   0xa   :  { %p348_p3 = scmp.ne.s32.totalorder %s16_s10, %s347_s18  ;;  %p353_p5 = scmp.lt.s32.totalorder %s347_s18, %s347_s18 }
   0xc   :  { %p354_p6 = por %p353_p5, %p352_p4 }
   0xe   :  { %p355_p7 = pnand %p354_p6, %p348_p3 }
  0x10   :  { %358 = shalt.err (!%p355_p7)
}
  0x11   :  { %s410_s19 = smov 128   ;;  %s411_s20 = smov 8  }
  0x12   :  { %21 = dma.hbm_to_vmem [thread:$0]  %s491_s0, 256, %s16_s10, [#allocation5], %s410_s19, %s410_s19, %s411_s20  }
  0x13   :  { %s412_s23 = smov [#allocation7]   ;;  %s359_s27 = scalar_lea.hbm %s492_s1, 256 }
  0x14   :  { %s27_s24 = sshll.u32 %s412_s23, 4  ;;  %p360_p8 = scmp.ne.s32.totalorder %s492_s1, %s359_s27  ;;  %s28_s24 = int_to_ptr.vmem [resolvable:$true] %s27_s24 }
  0x15   :  { %p363_p9 = scmp.lt.u32.totalorder %s359_s27, %s492_s1 }
  0x17   :  { %p365_p10 = pnand %p363_p9, %p360_p8 }
  0x19   :  { %368 = shalt.err (!%p365_p10)
}
  0x1a   :  { %s369_s4 = scalar_lea.vmem %s28_s24, 256  ;;  %p374_p12 = scmp.lt.s32.totalorder %s28_s24, %s28_s24 }
  0x1b   :  { %p370_p11 = scmp.ne.s32.totalorder %s28_s24, %s369_s4  ;;  %p375_p13 = scmp.lt.s32.totalorder %s369_s4, %s369_s4 }
  0x1d   :  { %p376_p0 = por %p375_p13, %p374_p12 }
  0x1f   :  { %p377_p1 = pnand %p376_p0, %p370_p11 }
  0x21   :  { %380 = shalt.err (!%p377_p1)
}
  0x22   :  { %33 = dma.hbm_to_vmem [thread:$0]  %s492_s1, 256, %s28_s24, [#allocation8], %s410_s19, %s410_s19, %s411_s20  }
  0x23   :  { %403 = dma.done.wait [#allocation5], 256  }
  0x24   :  { %404 = vsyncadd [#allocation5], 4294967040 }
  0x25   :  { %405 = dma.done.wait [#allocation8], 256  }
  0x26   :  { %406 = vsyncadd [#allocation8], 4294967040  ;;  %vm53_vm0 = vcmask 261120   ;;  %v51_v0 = vld [vmem:[#allocation7] sm:$0xff]  ;;  %v52_v1 = vld [vmem:[#allocation7 + $0x8] sm:$0xff]  ;;  %vm44_vm2 = vcmask 7168   ;;  %v147_v6 = vlaneseq }
  0x27   :  { %vm310_vm1 = vmpackc.low %vm53_vm0, %vm53_vm0  ;;  %v49_v2 = vld [vmem:[#allocation4] sm:$0xff]  ;;  %v309_v3 = vpack.c.bf16 %v52_v1, %v51_v0  ;;  %v50_v4 = vld [vmem:[#allocation4 + $0x8] sm:$0xff]  ;;  %v413_v5 = vmov -1e+30   ;;  %vm158_vm4 = vcmask 130048   ;;  %v414_v18 = vmov 0  }
  0x28   :  { %306 = vmatprep.mubr.msk.f32.mxu0 %vm53_vm0, %v49_v2  ;;  %45 = vst.msk [vmem:[#allocation2] sm:$0xff] %vm44_vm2, %v413_v5  ;;  %46 = vst.msk [vmem:[#allocation2 + $0x8] sm:$0xff] %vm44_vm2, %v413_v5  ;;  %v148_v7 = vshrl.u32 %v147_v6, 7  ;;  %v151_v8 = vand.u32 127, %v147_v6  ;;  %323 = vset.pattern.permute.xlu1 %v414_v18  ;;  %v415_v19 = vmov 0.0   ;;  %s416_s1 = smov [#allocation9]  }
  0x29   :  { %311 = vmatprep.subr.msk.bf16.mxu0 %vm310_vm1, %v309_v3  ;;  %324 = vset.pattern.permute.xlu0 %v414_v18  ;;  %47 = vst.msk [vmem:[#allocation3] sm:$0xff] %vm44_vm2, %v415_v19  ;;  %48 = vst.msk [vmem:[#allocation3 + $0x8] sm:$0xff] %vm44_vm2, %v415_v19  ;;  %s281_s6 = sshll.u32 %s416_s1, 4  ;;  %s282_s6 = int_to_ptr.vmem [resolvable:$true] %s281_s6 }
  0x2a   :  { %314 = vmatpush3.bf16.xpose.msk.msra.mxu0 %vm310_vm1, %v309_v3  ;;  %v149_v9 = vadd.s32 8, %v148_v7  ;;  %vm152_vm3 = vcmp.eq.s32.totalorder %v148_v7, %v151_v8  ;;  %s381_s7 = scalar_lea.vmem %s282_s6, 256  ;;  %p386_p3 = scmp.lt.s32.totalorder %s282_s6, %s282_s6 }
  0x2b   :  { %p382_p2 = scmp.ne.s32.totalorder %s282_s6, %s381_s7  ;;  %p387_p4 = scmp.lt.s32.totalorder %s381_s7, %s381_s7 }
  0x2c   :  { %vm153_vm5 = vcmp.eq.s32.totalorder %v149_v9, %v151_v8 }
  0x2d   :  { %p388_p5 = por %p387_p4, %p386_p3 }
  0x2f   :  { %v156_v20 = vld [vmem:[#allocation2] sm:$0xff]  ;;  %v157_v23 = vld [vmem:[#allocation2 + $0x8] sm:$0xff]  ;;  %p389_p6 = pnand %p388_p5, %p382_p2 }
  0x30   :  { %v173_v41 = vld [vmem:[#allocation3] sm:$0xff]  ;;  %v174_v45 = vld [vmem:[#allocation3 + $0x8] sm:$0xff] }
  0x31   :  { %307 = vmatmul.mubr.msk.f32.vlgmr.msra.gmra.mrb[0].mxu0 %vm53_vm0, %v50_v4 }
 0x104   :  { %v308_v10 = vpop.f32.mrb[0].mxu0 }
 0x105   :  { %v132_v11 = vpop.f32.mrb[1].mxu0  ;;  %v142_v12 = vmul.f32 2.0, %v308_v10 }
 0x106   :  { %v141_v13 = vmul.f32 2.0, %v132_v11 }
 0x107   :  { %v155_v16 = vsel %vm153_vm5, -inf, %v142_v12 }
 0x108   :  { %v154_v14 = vsel %vm152_vm3, -inf, %v141_v13  ;;  %v162_v17 = vsel %vm158_vm4, %v155_v16, -inf }
 0x109   :  { %v159_v15 = vsel %vm158_vm4, %v154_v14, -inf }
 0x10a   :  { %160 = vmax.xlane.f32.xlu0 %v159_v15 }
 0x10e   :  { %163 = vmax.xlane.f32.xlu0 %v162_v17 }
 0x197   :  { %v161_v21 = vpop.xlane.xlu0 %160 }
 0x198   :  { %v165_v22 = vmax.f32 %v156_v20, %v161_v21 }
 0x19a   :  { %v167_v24 = vsub.f32 %v156_v20, %v165_v22  ;;  %204 = vst.msk [vmem:[#allocation2] sm:$0xff] %vm44_vm2, %v165_v22  ;;  %179 = vperm.xlu1 %323, %v165_v22  }
 0x19b   :  { %v164_v25 = vpop.xlane.xlu0 %163 }
 0x19c   :  { %v166_v26 = vmax.f32 %v157_v23, %v164_v25  ;;  %v169_v38 = vmul.f32 1.442695, %v167_v24 }
 0x19e   :  { %v168_v27 = vsub.f32 %v157_v23, %v166_v26  ;;  %205 = vst.msk [vmem:[#allocation2 + $0x8] sm:$0xff] %vm44_vm2, %v166_v26  ;;  %184 = vperm.xlu1 %323, %v166_v26  }
 0x1a0   :  { %v171_v39 = vmul.f32 1.442695, %v168_v27 }
 0x1a1   :  { %v263_v54 = vld [vmem:[#allocation2] sm:$0xff] }
 0x1a5   :  { %v264_v58 = vld [vmem:[#allocation2 + $0x8] sm:$0xff] }
 0x219   :  { %v180_v28 = vpop.permute.xlu1 %179 }
 0x21a   :  { %v187_v29 = vsub.f32 %v154_v14, %v180_v28 }
 0x21c   :  { %v189_v30 = vmul.f32 1.442695, %v187_v29 }
 0x21d   :  { %v185_v31 = vpop.permute.xlu1 %184 }
 0x21e   :  { %325 = vpow2.f32 %v189_v30  ;;  %v188_v32 = vsub.f32 %v155_v16, %v185_v31 }
 0x220   :  { %v191_v33 = vmul.f32 1.442695, %v188_v32 }
 0x222   :  { %327 = vpow2.f32 %v191_v33 }
 0x223   :  { %329 = vpow2.f32 %v169_v38 }
 0x224   :  { %331 = vpow2.f32 %v171_v39 }
 0x228   :  { %v326_v34 = vpop.eup %325 }
 0x229   :  { %v193_v35 = vsel %vm158_vm4, %v326_v34, 0.0 }
 0x22a   :  { %194 = vadd.xlane.f32.xlu0 %v193_v35 }
 0x22c   :  { %v328_v36 = vpop.eup %327 }
 0x22d   :  { %v196_v37 = vsel %vm158_vm4, %v328_v36, 0.0  ;;  %v330_v40 = vpop.eup %329 }
 0x22e   :  { %197 = vadd.xlane.f32.xlu1 %v196_v37  ;;  %v175_v42 = vmul.f32 %v330_v40, %v173_v41  ;;  %v332_v43 = vpop.eup %331 }
 0x22f   :  { %v176_v47 = vmul.f32 %v332_v43, %v174_v45 }
 0x2b7   :  { %v195_v44 = vpop.xlane.xlu0 %194 }
 0x2b8   :  { %v199_v46 = vadd.f32 %v195_v44, %v175_v42 }
 0x2ba   :  { %202 = vst.msk [vmem:[#allocation3] sm:$0xff] %vm44_vm2, %v199_v46 }
 0x2bb   :  { %v198_v48 = vpop.xlane.xlu1 %197 }
 0x2bc   :  { %v200_v49 = vadd.f32 %v198_v48, %v176_v47 }
 0x2be   :  { %203 = vst.msk [vmem:[#allocation3 + $0x8] sm:$0xff] %vm44_vm2, %v200_v49 }
 0x2c1   :  { %v265_v50 = vld [vmem:[#allocation3] sm:$0xff] }
 0x2c2   :  { %333 = vlog2.f32 %v265_v50 }
 0x2c5   :  { %v266_v51 = vld [vmem:[#allocation3 + $0x8] sm:$0xff] }
 0x2c6   :  { %335 = vlog2.f32 %v266_v51 }
 0x2cc   :  { %v334_v52 = vpop.eup %333 }
 0x2cd   :  { %v268_v53 = vmul.f32 0.6931472, %v334_v52 }
 0x2cf   :  { %v271_v55 = vadd.f32 %v268_v53, %v263_v54 }
 0x2d0   :  { %v336_v56 = vpop.eup %335 }
 0x2d1   :  { %v270_v57 = vmul.f32 0.6931472, %v336_v56  ;;  %274 = vst.msk [vmem:[#allocation9] sm:$0xff] %vm44_vm2, %v271_v55 }
 0x2d3   :  { %v272_v59 = vadd.f32 %v270_v57, %v264_v58 }
 0x2d5   :  { %275 = vst.msk [vmem:[#allocation9 + $0x8] sm:$0xff] %vm44_vm2, %v272_v59 }
 0x2d6   :  { %392 = shalt.err (!%p389_p6)
}
 0x2d7   :  { %s393_s10 = scalar_lea.hbm %s493_s2, 256 }
 0x2d8   :  { %p394_p7 = scmp.ne.s32.totalorder %s493_s2, %s393_s10  ;;  %p397_p8 = scmp.lt.u32.totalorder %s393_s10, %s493_s2 }
 0x2da   :  { %p399_p9 = pnand %p397_p8, %p394_p7 }
 0x2dc   :  { %402 = shalt.err (!%p399_p9)
}
 0x2dd   :  { %287 = dma.vmem_to_hbm [thread:$0]  %s282_s6, 256, %s493_s2, [#allocation6], %s410_s19, %s410_s19, %s411_s20  }
 0x2de   :  { %407 = dma.done.wait [#allocation6], 256  }
 0x2df   :  { %408 = vsyncadd [#allocation6], 4294967040 }
 0x2e0   :  { %291 = vsyncpa [#allocation5], 1 }
 0x2e1   :  { %292 = vsyncpa [#allocation8], 1 }
 0x2e2   :  { %293 = vsyncpa [#allocation6], 1 }

</bundles_post_ra>
